<compile_context>
chip_gen: v7x
topology: tpu7x:2x2x1
jax: 0.10.0
libtpu: 0.0.40
codegen_flags: <defaults>
</compile_context>

<pallas_src>
import functools

import jax
import jax.numpy as jnp
from jax import lax
from jax.experimental import pallas as pl
from jax.experimental.pallas import tpu as pltpu

_LANE = 128      # K tiles are multiples of the lane width
_SUBLANE = 8     # NC rows padded (rarely) to a multiple of the sublane width

# Opt-in (recommended on v5e for f32 inputs with NC >= 256): cast features to
# bf16 before the matmul so HBM bytes halve and the MXU stays fed.  Slightly
# changes the loss numerics; accumulation stays f32.  Off by default.
CAST_F32_INPUT_TO_BF16 = False

_VMEM_CAPACITY = None
_BUFFERED_TARGET_OK = True   # flipped off if this jax build rejects pl.Buffered(1)


def _round_up(x, m):
    return (x + m - 1) // m * m


def _vmem_capacity():
    global _VMEM_CAPACITY
    if _VMEM_CAPACITY is None:
        try:
            _VMEM_CAPACITY = int(pltpu.get_tpu_info().vmem_capacity_bytes)
        except Exception:
            _VMEM_CAPACITY = 64 * 1024 * 1024   # conservative (v7x-sized)
    return _VMEM_CAPACITY


def _budget():
    cap = _vmem_capacity()
    tile_budget = int(cap * 0.75)
    tk_max = 8192 if cap >= (96 << 20) else 2048
    return tile_budget, tk_max


def _pick_tk(rows, hw, itemsize, resident_bytes):
    """Largest 128-multiple K tile whose double-buffered stream fits VMEM.

    Returns None when even TK=128 doesn't fit next to the resident set
    (very large N*C) -> caller switches to the output-tiled Gram path.
    """
    tile_budget, tk_max = _budget()
    avail = tile_budget - resident_bytes - (2 << 20)
    tk = (avail // (2 * rows * itemsize)) // _LANE * _LANE
    if tk < _LANE:
        return None
    return int(min(tk, tk_max, _round_up(hw, _LANE)))


def _compiler_params(est_bytes, semantics):
    cap = _vmem_capacity()
    limit = int(min(max(est_bytes + (4 << 20), 32 << 20), int(cap * 0.9)))
    return pltpu.CompilerParams(
        dimension_semantics=semantics,
        vmem_limit_bytes=limit,
    )


def _prep_features(x_nchw):
    """NCHW -> (NCp, HW) slab; no HW padding and (almost always) no copy."""
    n, c, h, w = x_nchw.shape
    nc, hw = n * c, h * w
    f = x_nchw.reshape(nc, hw)                 # free reshape, no extra HBM pass
    if CAST_F32_INPUT_TO_BF16 and f.dtype == jnp.float32:
        f = f.astype(jnp.bfloat16)
    ncp = _round_up(max(nc, 1), _SUBLANE)
    if ncp != nc:                              # rare: NC not a multiple of 8
        f = jnp.pad(f, ((0, ncp - nc), (0, 0)))
    return f, nc, ncp, hw


def _mask_k_tail(tile, k, tk, hw):
    """Zero the out-of-range columns of the (possibly partial) last K tile."""
    col = k * tk + lax.broadcasted_iota(jnp.int32, tile.shape, 1)
    return jnp.where(col < hw, tile, jnp.zeros([], tile.dtype))


# --------------------------------------------------------------------------
# Kernels
# --------------------------------------------------------------------------

def _gram_kernel(feat_ref, gram_ref, *, inv_norm, hw, tk):
    """Accumulate F_k @ F_k^T directly into the resident output block."""
    k = pl.program_id(0)

    @pl.when(k == 0)
    def _():
        gram_ref[...] = jnp.zeros_like(gram_ref)

    f = feat_ref[...]                          # native dtype into the MXU
    if hw % tk:                                # static: only if a K tail exists
        f = _mask_k_tail(f, k, tk, hw)
    gram_ref[...] += lax.dot_general(
        f, f,
        dimension_numbers=(((1,), (1,)), ((), ())),   # F @ F^T (transposed RHS)
        preferred_element_type=jnp.float32,
    )

    @pl.when(k == pl.num_programs(0) - 1)
    def _():
        gram_ref[...] = gram_ref[...] * inv_norm


def _gram_tiled_kernel(a_ref, b_ref, gram_ref, *, inv_norm, hw, tk):
    """Output-tiled Gram for very large N*C: grid (i, j, k), out block (i, j)."""
    k = pl.program_id(2)

    @pl.when(k == 0)
    def _():
        gram_ref[...] = jnp.zeros_like(gram_ref)

    a = a_ref[...]
    b = b_ref[...]
    if hw % tk:
        a = _mask_k_tail(a, k, tk, hw)
        b = _mask_k_tail(b, k, tk, hw)
    gram_ref[...] += lax.dot_general(
        a, b,
        dimension_numbers=(((1,), (1,)), ((), ())),
        preferred_element_type=jnp.float32,
    )

    @pl.when(k == pl.num_programs(2) - 1)
    def _():
        gram_ref[...] = gram_ref[...] * inv_norm


def _gram_mse_kernel(feat_ref, target_ref, loss_ref, acc_ref, *,
                     inv_norm, inv_count, hw, tk):
    """Accumulate the Gram; at the last K tile emit mse(G/norm, target)."""
    k = pl.program_id(0)

    @pl.when(k == 0)
    def _():
        acc_ref[...] = jnp.zeros_like(acc_ref)

    f = feat_ref[...]
    if hw % tk:
        f = _mask_k_tail(f, k, tk, hw)
    acc_ref[...] += lax.dot_general(
        f, f,
        dimension_numbers=(((1,), (1,)), ((), ())),
        preferred_element_type=jnp.float32,
    )

    @pl.when(k == pl.num_programs(0) - 1)
    def _():
        diff = acc_ref[...] * inv_norm - target_ref[...].astype(jnp.float32)
        loss_ref[0] = jnp.sum(diff * diff) * inv_count


# --------------------------------------------------------------------------
# pallas_call builders (cached + jitted so repeated style-loss calls reuse
# the compiled executable)
# --------------------------------------------------------------------------

@functools.lru_cache(maxsize=None)
def _build_gram_call(ncp, hw, tk, norm, dtype_name, itemsize):
    kt = pl.cdiv(hw, tk)
    kernel = functools.partial(_gram_kernel, inv_norm=1.0 / float(norm),
                               hw=hw, tk=tk)
    est = 2 * ncp * tk * itemsize + 2 * ncp * ncp * 4
    call = pl.pallas_call(
        kernel,
        out_shape=jax.ShapeDtypeStruct((ncp, ncp), jnp.float32),
        grid_spec=pltpu.PrefetchScalarGridSpec(
            num_scalar_prefetch=0,
            grid=(kt,),
            in_specs=[pl.BlockSpec((ncp, tk), lambda k: (0, k))],
            # Constant index_map over the reduction axis => the output block is
            # VMEM-resident and doubles as the accumulator (no scratch needed).
            out_specs=pl.BlockSpec((ncp, ncp), lambda k: (0, 0)),
        ),
        compiler_params=_compiler_params(est, ("arbitrary",)),
    )
    return jax.jit(call)


@functools.lru_cache(maxsize=None)
def _build_gram_tiled_call(ncp, hw, tk, norm, tile_nc, dtype_name, itemsize):
    kt = pl.cdiv(hw, tk)
    ni = pl.cdiv(ncp, tile_nc)
    kernel = functools.partial(_gram_tiled_kernel, inv_norm=1.0 / float(norm),
                               hw=hw, tk=tk)
    est = 4 * tile_nc * tk * itemsize + 2 * tile_nc * tile_nc * 4
    call = pl.pallas_call(
        kernel,
        out_shape=jax.ShapeDtypeStruct((ncp, ncp), jnp.float32),
        grid_spec=pltpu.PrefetchScalarGridSpec(
            num_scalar_prefetch=0,
            grid=(ni, ni, kt),
            in_specs=[pl.BlockSpec((tile_nc, tk), lambda i, j, k: (i, k)),
                      pl.BlockSpec((tile_nc, tk), lambda i, j, k: (j, k))],
            out_specs=pl.BlockSpec((tile_nc, tile_nc), lambda i, j, k: (i, j)),
        ),
        compiler_params=_compiler_params(
            est, ("parallel", "parallel", "arbitrary")),
    )
    return jax.jit(call)


@functools.lru_cache(maxsize=None)
def _build_gram_mse_call(ncp, hw, tk, norm, n_real, dtype_name, itemsize,
                         buffered_target):
    kt = pl.cdiv(hw, tk)
    kernel = functools.partial(
        _gram_mse_kernel, inv_norm=1.0 / float(norm),
        inv_count=1.0 / float(n_real), hw=hw, tk=tk)
    est = 2 * ncp * tk * itemsize + 2 * ncp * ncp * 4
    if buffered_target:
        # Read-only, constant-index resident target: single buffer (no second
        # NCp^2 f32 allocation).
        target_spec = pl.BlockSpec((ncp, ncp), lambda k: (0, 0),
                                   pipeline_mode=pl.Buffered(1))
    else:
        target_spec = pl.BlockSpec((ncp, ncp), lambda k: (0, 0))
        est += ncp * ncp * 4                   # default double-buffered target
    call = pl.pallas_call(
        kernel,
        out_shape=jax.ShapeDtypeStruct((1,), jnp.float32),
        grid_spec=pltpu.PrefetchScalarGridSpec(
            num_scalar_prefetch=0,
            grid=(kt,),
            in_specs=[pl.BlockSpec((ncp, tk), lambda k: (0, k)), target_spec],
            out_specs=pl.BlockSpec(memory_space=pltpu.MemorySpace.SMEM),
            scratch_shapes=[pltpu.VMEM((ncp, ncp), jnp.float32)],
        ),
        compiler_params=_compiler_params(est, ("arbitrary",)),
    )
    return jax.jit(call)


# --------------------------------------------------------------------------
# Wrappers / public API (mirrors the PyTorch module)
# --------------------------------------------------------------------------

def _gram_padded(feats, ncp, hw, norm):
    """(NCp, NCp) Gram of the prepared feature slab (padded region is zero)."""
    itemsize = feats.dtype.itemsize
    resident = 2 * ncp * ncp * 4               # resident output, charged x2
    tk = _pick_tk(ncp, hw, itemsize, resident)
    if tk is not None:
        call = _build_gram_call(ncp, hw, tk, norm, feats.dtype.name, itemsize)
        return call(feats)
    # Very large N*C: tile the Gram output so VMEM never holds NC^2 at once.
    tile_nc = 256
    tk = _pick_tk(2 * tile_nc, hw, itemsize, 2 * tile_nc * tile_nc * 4) or _LANE
    call = _build_gram_tiled_call(ncp, hw, tk, norm, tile_nc,
                                  feats.dtype.name, itemsize)
    return call(feats, feats)


def gram_matrix(x_nchw):
    """Pallas-backed gram_fn: G = F @ F^T / (a*b*c*d), shape (N*C, N*C)."""
    x = jnp.asarray(x_nchw)
    n, c, h, w = x.shape
    feats, nc, ncp, hw = _prep_features(x)
    g = _gram_padded(feats, ncp, hw, n * c * h * w)
    return g[:nc, :nc]


class StyleLoss:
    """JAX/Pallas port of the PyTorch StyleLoss module (forward pass only)."""

    def __init__(self, target_feature):
        t = jnp.asarray(target_feature)
        n, c, h, w = t.shape
        feats, nc, ncp, hw = _prep_features(t)
        gram_padded = jax.lax.stop_gradient(
            _gram_padded(feats, ncp, hw, n * c * h * w))
        self._nc = nc
        self._ncp = ncp
        self._target_padded = gram_padded        # zero in the padded region
        self.target = gram_padded[:nc, :nc]      # matches PyTorch .target
        self.loss = None

    def __call__(self, x):
        global _BUFFERED_TARGET_OK
        x = jnp.asarray(x)
        n, c, h, w = x.shape
        feats, nc, ncp, hw = _prep_features(x)
        if nc != self._nc:
            raise ValueError("input N*C must match the target feature's N*C")
        norm = n * c * h * w
        itemsize = feats.dtype.itemsize
        resident = 2 * ncp * ncp * 4             # f32 accumulator + target
        tk = _pick_tk(ncp, hw, itemsize, resident)
        if tk is not None:
            if _BUFFERED_TARGET_OK:
                try:
                    call = _build_gram_mse_call(ncp, hw, tk, norm, nc * nc,
                                                feats.dtype.name, itemsize, True)
                    self.loss = call(feats, self._target_padded)[0]
                    return x
                except Exception:
                    _BUFFERED_TARGET_OK = False   # build rejects pl.Buffered(1)
            call = _build_gram_mse_call(ncp, hw, tk, norm, nc * nc,
                                        feats.dtype.name, itemsize, False)
            self.loss = call(feats, self._target_padded)[0]
            return x
        # Very large N*C: resident Gram does not fit VMEM -> output-tiled Gram
        # kernel + tiny jnp MSE epilogue (NC^2 f32, negligible vs the stream).
        g = _gram_padded(feats, ncp, hw, norm)
        self.loss = jnp.mean((g[:nc, :nc] - self.target) ** 2)
        return x


if __name__ == "__main__":
    key = jax.random.PRNGKey(0)
    k1, k2, k3, k4 = jax.random.split(key, 4)

    def gram_ref(t):
        n, c, h, w = t.shape
        f = t.reshape(n * c, h * w).astype(jnp.float32)
        return (f @ f.T) / (n * c * h * w)

    # Case 1: module-sized shapes (lane-aligned HW, no K-tail mask).
    target_feature = jax.random.normal(k1, (2, 4, 16, 16), jnp.float32)
    x = jax.random.normal(k2, (2, 4, 16, 16), jnp.float32)
    module = StyleLoss(target_feature)
    out = jax.block_until_ready(module(x))
    loss = jax.block_until_ready(module.loss)
    g_in, g_tgt = gram_ref(x), gram_ref(target_feature)
    loss_ref = jnp.mean((g_in - g_tgt) ** 2)
    assert out.shape == x.shape and jnp.allclose(out, x)
    assert jnp.allclose(module.target, g_tgt, rtol=1e-5, atol=1e-6)
    assert jnp.allclose(gram_matrix(x), g_in, rtol=1e-5, atol=1e-6)
    assert jnp.allclose(loss, loss_ref, rtol=1e-5, atol=1e-6), (loss, loss_ref)

    # Case 2: HW not lane-aligned (9x9) -> exercises the in-kernel K-tail mask.
    tf2 = jax.random.normal(k3, (1, 16, 9, 9), jnp.float32)
    x2 = jax.random.normal(k4, (1, 16, 9, 9), jnp.float32)
    m2 = StyleLoss(tf2)
    _ = jax.block_until_ready(m2(x2))
    loss2 = jax.block_until_ready(m2.loss)
    loss2_ref = jnp.mean((gram_ref(x2) - gram_ref(tf2)) ** 2)
    assert jnp.allclose(gram_matrix(x2), gram_ref(x2), rtol=1e-5, atol=1e-6)
    assert jnp.allclose(loss2, loss2_ref, rtol=1e-5, atol=1e-6), (loss2, loss2_ref)

    # Case 3: exercise the large-NC output-tiled Gram fallback on small data.
    x3 = jax.random.normal(k2, (2, 128, 8, 8), jnp.float32)
    f3, nc3, ncp3, hw3 = _prep_features(x3)
    tiled = _build_gram_tiled_call(ncp3, hw3, 128, int(x3.size), 128,
                                   f3.dtype.name, f3.dtype.itemsize)
    g3 = jax.block_until_ready(tiled(f3, f3))
    assert jnp.allclose(g3[:nc3, :nc3], gram_ref(x3), rtol=1e-5, atol=1e-6)

    print("KERNEL_OK")
</pallas_src>

<mosaic_0001>
module attributes {stable_mosaic.version = 11 : i64} {
  func.func @_gram_kernel(%arg0: i32, %arg1: memref<8x256xf32, #tpu.memory_space<vmem>>, %arg2: memref<8x8xf32, #tpu.memory_space<vmem>>) attributes {dimension_semantics = [#tpu.dimension_semantics<arbitrary>], iteration_bounds = array<i64: 1>, scalar_prefetch = 0 : i64, scratch_operands = 0 : i64, tpu.core_type = #tpu.core_type<tc>, window_params = [{transform_indices = @transform_0, window_bounds = array<i64: 8, 256>}, {pipeline_mode = #tpu.pipeline_mode<synchronous>, transform_indices = @transform_1, window_bounds = array<i64: 8, 8>}]} {
    %c0_i32 = arith.constant 0 : i32
    %0 = arith.cmpi eq, %arg0, %c0_i32 : i32
    %1 = arith.extui %0 : i1 to i32
    %c0_i32_0 = arith.constant 0 : i32
    %2 = arith.cmpi ne, %1, %c0_i32_0 : i32
    scf.if %2 {
      %cst_8 = arith.constant 0.000000e+00 : f32
      %11 = vector.broadcast %cst_8 : f32 to vector<8x8xf32>
      %c0_9 = arith.constant 0 : index
      %c0_10 = arith.constant 0 : index
      %12 = vector.load %arg2[%c0_9, %c0_10] : memref<8x8xf32, #tpu.memory_space<vmem>>, vector<8x8xf32>
      tpu.vector_store %arg2[%c0_9, %c0_10], %11 {strides = array<i32>} : memref<8x8xf32, #tpu.memory_space<vmem>>, vector<8x8xf32>,
    } else {
    }
    %c0 = arith.constant 0 : index
    %c0_1 = arith.constant 0 : index
    %3 = vector.load %arg1[%c0, %c0_1] : memref<8x256xf32, #tpu.memory_space<vmem>>, vector<8x256xf32>
    %c0_2 = arith.constant 0 : index
    %c0_3 = arith.constant 0 : index
    %4 = vector.load %arg2[%c0_2, %c0_3] : memref<8x8xf32, #tpu.memory_space<vmem>>, vector<8x8xf32>
    %cst = arith.constant dense<0.000000e+00> : vector<8x8xf32>
    %5 = tpu.matmul %3, %3, %cst {dimension_numbers = #tpu.dot_dimension_numbers<[1], [1], [0], [0], [0, 0, 1, 0], [], []>} : vector<8x256xf32>, vector<8x256xf32>, vector<8x8xf32> -> vector<8x8xf32>
    %6 = arith.addf %4, %5 : vector<8x8xf32>
    %c0_4 = arith.constant 0 : index
    %c0_5 = arith.constant 0 : index
    %7 = vector.load %arg2[%c0_4, %c0_5] : memref<8x8xf32, #tpu.memory_space<vmem>>, vector<8x8xf32>
    tpu.vector_store %arg2[%c0_4, %c0_5], %6 {strides = array<i32>} : memref<8x8xf32, #tpu.memory_space<vmem>>, vector<8x8xf32>,
    %c0_i32_6 = arith.constant 0 : i32
    %8 = arith.cmpi eq, %arg0, %c0_i32_6 : i32
    %9 = arith.extui %8 : i1 to i32
    %c0_i32_7 = arith.constant 0 : i32
    %10 = arith.cmpi ne, %9, %c0_i32_7 : i32
    scf.if %10 {
      %c0_8 = arith.constant 0 : index
      %c0_9 = arith.constant 0 : index
      %11 = vector.load %arg2[%c0_8, %c0_9] : memref<8x8xf32, #tpu.memory_space<vmem>>, vector<8x8xf32>
      %cst_10 = arith.constant 4.8828125E-4 : f32
      %12 = vector.broadcast %cst_10 : f32 to vector<8x8xf32>
      %13 = arith.mulf %11, %12 : vector<8x8xf32>
      %c0_11 = arith.constant 0 : index
      %c0_12 = arith.constant 0 : index
      %14 = vector.load %arg2[%c0_11, %c0_12] : memref<8x8xf32, #tpu.memory_space<vmem>>, vector<8x8xf32>
      tpu.vector_store %arg2[%c0_11, %c0_12], %13 {strides = array<i32>} : memref<8x8xf32, #tpu.memory_space<vmem>>, vector<8x8xf32>,
    } else {
    }
    return
  }
  func.func @transform_0(%arg0: i32) -> (i32, i32) {
    %c0_i32 = arith.constant 0 : i32
    %c0_i32_0 = arith.constant 0 : i32
    return %c0_i32, %arg0 : i32, i32
  }
  func.func @transform_1(%arg0: i32) -> (i32, i32) {
    %c0_i32 = arith.constant 0 : i32
    %c0_i32_0 = arith.constant 0 : i32
    %c0_i32_1 = arith.constant 0 : i32
    return %c0_i32, %c0_i32_0 : i32, i32
  }
}

</mosaic_0001>

<bundles_post_ra>
// kernel: tpu_custom_call.1
= control target key start
LH: loop header
LB: loop body
LE: loop exit
PB: predicated region body
PF: predicated region fallthrough
CT: control target
= control target key end

     0   :  { %6 = vsyncpa [#allocation3], 0  ;;  %s215_s0 = inlined_call_operand.hbm [shape: f32[8,256], index: 0, kind: input, shape index: {}]   ;;  %s216_s1 = inlined_call_operand.hbm [shape: f32[8,8], index: 1, kind: output, shape index: {}]  }
   0x1   :  { %7 = vsyncpa [#allocation4], 0  ;;  %s175_s6 = smov [#allocation2]   ;;  %s127_s10 = scalar_lea.hbm %s215_s0, 256 }
   0x2   :  { %s14_s7 = sshll.u32 %s175_s6, 4  ;;  %p128_p0 = scmp.ne.s32.totalorder %s215_s0, %s127_s10  ;;  %s15_s7 = int_to_ptr.vmem [resolvable:$true] %s14_s7 }
   0x3   :  { %p131_p1 = scmp.lt.u32.totalorder %s127_s10, %s215_s0 }
   0x5   :  { %p133_p2 = pnand %p131_p1, %p128_p0 }
   0x7   :  { %136 = shalt.err (!%p133_p2)
}
   0x8   :  { %s137_s15 = scalar_lea.vmem %s15_s7, 256  ;;  %p142_p4 = scmp.lt.s32.totalorder %s15_s7, %s15_s7 }
   0x9   :  { %p138_p3 = scmp.ne.s32.totalorder %s15_s7, %s137_s15  ;;  %p143_p5 = scmp.lt.s32.totalorder %s137_s15, %s137_s15 }
   0xb   :  { %p144_p6 = por %p143_p5, %p142_p4 }
   0xd   :  { %p145_p7 = pnand %p144_p6, %p138_p3 }
   0xf   :  { %148 = shalt.err (!%p145_p7)
}
  0x10   :  { %17 = dma.hbm_to_vmem [thread:$0]  %s215_s0, 256, %s15_s7, [#allocation3]  }
  0x11   :  { %171 = dma.done.wait [#allocation3], 256  }
  0x12   :  { %172 = vsyncadd [#allocation3], 4294967040  ;;  %vm25_vm0 = vcmask 64512   ;;  %v176_v0 = vmov 0.0   ;;  %v28_v1 = vld [vmem:[#allocation2 + $0x8] sm:$0xff]  ;;  %v27_v2 = vld [vmem:[#allocation2] sm:$0xff] }
  0x13   :  { %26 = vst.msk [vmem:[#allocation5] sm:$0xff] %vm25_vm0, %v176_v0  ;;  %30 = vmatprep.subr.mxu0 %v28_v1  ;;  %94 = vmatprep.mubr.f32.mxu0 %v28_v1  ;;  %s177_s18 = smov [#allocation5]  }
  0x14   :  { %31 = vmatpush1.xpose.msra.mxu0 %v27_v2  ;;  %s115_s0 = sshll.u32 %s177_s18, 4  ;;  %s116_s0 = int_to_ptr.vmem [resolvable:$true] %s115_s0 }
  0x15   :  { %s149_s19 = scalar_lea.vmem %s116_s0, 128  ;;  %p154_p9 = scmp.lt.s32.totalorder %s116_s0, %s116_s0 }
  0x16   :  { %p150_p8 = scmp.ne.s32.totalorder %s116_s0, %s149_s19  ;;  %p155_p10 = scmp.lt.s32.totalorder %s149_s19, %s149_s19 }
  0x17   :  { %95 = vmatmul.mubr.f32.vlgmr.msra.gmra.mrb[0].mxu0 %v27_v2 }
  0x18   :  { %p156_p11 = por %p155_p10, %p154_p9 }
  0x1a   :  { %v29_v3 = vld [vmem:[#allocation5] sm:$0xff]  ;;  %p157_p12 = pnand %p156_p11, %p150_p8 }
  0xea   :  { %v96_v4 = vpop.f32.mrb[0].mxu0 }
  0xeb   :  { %v100_v5 = vadd.f32 %v96_v4, %v29_v3  ;;  %v98_v6 = vpop.f32.mrb[1].mxu0 }
  0xed   :  { %102 = vst.msk [vmem:[#allocation5] sm:$0xff] %vm25_vm0, %v100_v5 }
  0xf4   :  { %v106_v7 = vld [vmem:[#allocation5] sm:$0xff] }
  0xf5   :  { %v107_v8 = vmul.f32 0.00048828125, %v106_v7 }
  0xf7   :  { %108 = vst.msk [vmem:[#allocation5] sm:$0xff] %vm25_vm0, %v107_v8 }
  0xf8   :  { %160 = shalt.err (!%p157_p12)
}
  0xf9   :  { %s161_s22 = scalar_lea.hbm %s216_s1, 128 }
  0xfa   :  { %p162_p13 = scmp.ne.s32.totalorder %s216_s1, %s161_s22  ;;  %p165_p0 = scmp.lt.u32.totalorder %s161_s22, %s216_s1 }
  0xfc   :  { %p167_p1 = pnand %p165_p0, %p162_p13 }
  0xfe   :  { %170 = shalt.err (!%p167_p1)
}
  0xff   :  { %118 = dma.vmem_to_hbm [thread:$0]  %s116_s0, 128, %s216_s1, [#allocation4]  }
 0x100   :  { %173 = dma.done.wait [#allocation4], 128  }
 0x101   :  { %174 = vsyncadd [#allocation4], 4294967168 }
 0x102   :  { %122 = vsyncpa [#allocation3], 1 }
 0x103   :  { %123 = vsyncpa [#allocation4], 1 }

</bundles_post_ra>
